<compile_context>
chip_gen: v7x
topology: tpu7x:2x2x1
jax: 0.10.0
libtpu: 0.0.40
codegen_flags: <defaults>
</compile_context>

<pallas_src>
import math

import jax
import jax.numpy as jnp
from jax import lax
from jax.experimental import pallas as pl
from jax.experimental.pallas import tpu as pltpu


def _round_up(n, m):
    return ((n + m - 1) // m) * m


def _choose_tile_rows(rows, hidden, io_itemsize, n_streams,
                      vmem_budget_bytes=20 * 1024 * 1024, cap=2048):
    """Largest row tile whose double-buffered I/O (+ f32 temporaries) fits the budget."""
    bytes_per_row = n_streams * 2 * hidden * io_itemsize + 4 * hidden * 4
    tr = int(vmem_budget_bytes // max(bytes_per_row, 1))
    tr = max(8, min(tr, cap))
    # sublane alignment: 8 rows for 4-byte dtypes, 16 for bf16, 32 for 1-byte
    align = max(8, 32 // max(io_itemsize, 1))
    tr = max(align, (tr // align) * align)
    # never use a tile (much) larger than the problem itself
    tr = min(tr, _round_up(rows, align))
    return tr


def make_sublayer_connection_kernel(size, dropout_p, eps=1e-5, tile_rows=None):
    """Returns apply(x, sub_out, gamma, beta, rng) -> LayerNorm(x + dropout(sub_out))."""
    has_dropout = dropout_p > 0.0
    inv_keep = 1.0 / (1.0 - dropout_p) if has_dropout else 1.0

    def kernel(*refs):
        if has_dropout:
            x_ref, s_ref, m_ref, g_ref, b_ref, o_ref = refs
        else:
            x_ref, s_ref, g_ref, b_ref, o_ref = refs
            m_ref = None

        x = x_ref[...].astype(jnp.float32)
        sub = s_ref[...].astype(jnp.float32)
        if has_dropout:
            # inverted dropout: keep-mask precomputed in JAX (tiling-independent)
            sub = sub * (m_ref[...].astype(jnp.float32) * inv_keep)

        z = x + sub

        # One-pass LayerNorm statistics (biased variance, like nn.LayerNorm).
        d_inv = 1.0 / size
        mean = jnp.sum(z, axis=-1, keepdims=True) * d_inv
        mean_sq = jnp.sum(z * z, axis=-1, keepdims=True) * d_inv
        var = jnp.maximum(mean_sq - mean * mean, 0.0)
        inv = lax.rsqrt(var + eps)

        g = g_ref[...].astype(jnp.float32)
        b = b_ref[...].astype(jnp.float32)
        o_ref[...] = ((z - mean) * inv * g + b).astype(o_ref.dtype)

    def apply(x, sub_out, gamma, beta, rng=None):
        orig_shape = x.shape
        D = orig_shape[-1]
        assert D == size
        rows = math.prod(orig_shape[:-1])

        x2 = x.reshape(rows, D)
        s2 = sub_out.reshape(rows, D).astype(x.dtype)
        g2 = gamma.reshape(1, D)
        b2 = beta.reshape(1, D)

        n_streams = 4 if has_dropout else 3  # x, sub, (mask,), out
        io_itemsize = jnp.dtype(x.dtype).itemsize
        tr = tile_rows or _choose_tile_rows(rows, D, io_itemsize, n_streams)
        grid = (pl.cdiv(rows, tr),)

        row_spec = pl.BlockSpec((tr, D), lambda i: (i, 0))
        vec_spec = pl.BlockSpec((1, D), lambda i: (0, 0))

        operands = [x2, s2]
        in_specs = [row_spec, row_spec]
        if has_dropout:
            assert rng is not None, "dropout requires an rng key"
            # TODO(synk): on real TPU this mask could come from pltpu.prng_random_bits
            # inside the kernel (zero extra HBM traffic); the interpret/CPU path has no
            # lowering for prng_seed, so the mask is generated here instead.
            keep = jax.random.bernoulli(rng, 1.0 - dropout_p, (rows, D))
            operands.append(keep.astype(x.dtype))
            in_specs.append(row_spec)
        operands += [g2, b2]
        in_specs += [vec_spec, vec_spec]

        out = pl.pallas_call(
            kernel,
            out_shape=jax.ShapeDtypeStruct((rows, D), x.dtype),
            grid=grid,
            in_specs=in_specs,
            out_specs=row_spec,
            compiler_params=pltpu.CompilerParams(
                dimension_semantics=("parallel",),
                vmem_limit_bytes=64 * 1024 * 1024,
            ),
        )(*operands)
        return out.reshape(orig_shape)

    return apply


if __name__ == "__main__":
    # Small deterministic setup: batch=2, seq=8, hidden(size)=128
    B, S, D = 2, 8, 128
    dropout_p = 0.1

    key = jax.random.PRNGKey(0)
    kx, kw, kb, kdrop = jax.random.split(key, 4)
    x = jax.random.normal(kx, (B, S, D), dtype=jnp.float32)

    # nn.LayerNorm default init: weight=1, bias=0
    ln_gamma = jnp.ones((D,), jnp.float32)
    ln_beta = jnp.zeros((D,), jnp.float32)

    # Example `sublayer`: a simple deterministic linear map, applied as glue
    # since `sublayer` is an arbitrary callable in the PyTorch module.
    W = jax.random.normal(kw, (D, D), dtype=jnp.float32) * (1.0 / math.sqrt(D))
    bvec = jax.random.normal(kb, (D,), dtype=jnp.float32) * 0.01
    sublayer = lambda t: t @ W + bvec
    # TODO(synk): if the sublayer is known to be a matmul, fuse it into the same
    # pallas_call (K grid axis + VMEM f32 accumulator) to remove the sub_out HBM
    # round-trip; it is kept opaque here to match the module's arbitrary callable.
    sub_out = sublayer(x)

    # Train mode (with dropout).
    apply_train = make_sublayer_connection_kernel(D, dropout_p)
    out = apply_train(x, sub_out, ln_gamma, ln_beta, rng=kdrop)
    out = jax.block_until_ready(out)
    assert out.shape == (B, S, D) and out.dtype == jnp.float32
    assert bool(jnp.all(jnp.isfinite(out)))

    # Eval mode (dropout disabled) -- cross-check against a plain-JAX reference.
    apply_eval = make_sublayer_connection_kernel(D, 0.0)
    out_eval = jax.block_until_ready(apply_eval(x, sub_out, ln_gamma, ln_beta))
    z = x + sub_out
    mu = z.mean(-1, keepdims=True)
    ref = (z - mu) / jnp.sqrt(z.var(-1, keepdims=True) + 1e-5) * ln_gamma + ln_beta
    assert bool(jnp.allclose(out_eval, ref, atol=1e-4, rtol=1e-4))

    print("KERNEL_OK")
</pallas_src>

<mosaic_0001>
module attributes {stable_mosaic.version = 11 : i64} {
  func.func @kernel(%arg0: i32, %arg1: memref<16x128xf32, #tpu.memory_space<vmem>>, %arg2: memref<16x128xf32, #tpu.memory_space<vmem>>, %arg3: memref<16x128xf32, #tpu.memory_space<vmem>>, %arg4: memref<1x128xf32, #tpu.memory_space<vmem>>, %arg5: memref<1x128xf32, #tpu.memory_space<vmem>>, %arg6: memref<16x128xf32, #tpu.memory_space<vmem>>) attributes {dimension_semantics = [#tpu.dimension_semantics<parallel>], iteration_bounds = array<i64: 1>, scalar_prefetch = 0 : i64, scratch_operands = 0 : i64, tpu.core_type = #tpu.core_type<tc>, window_params = [{transform_indices = @transform_0, window_bounds = array<i64: 16, 128>}, {transform_indices = @transform_1, window_bounds = array<i64: 16, 128>}, {transform_indices = @transform_2, window_bounds = array<i64: 16, 128>}, {pipeline_mode = #tpu.pipeline_mode<synchronous>, transform_indices = @transform_3, window_bounds = array<i64: 1, 128>}, {pipeline_mode = #tpu.pipeline_mode<synchronous>, transform_indices = @transform_4, window_bounds = array<i64: 1, 128>}, {transform_indices = @transform_5, window_bounds = array<i64: 16, 128>}]} {
    %c0 = arith.constant 0 : index
    %c0_0 = arith.constant 0 : index
    %0 = vector.load %arg1[%c0, %c0_0] : memref<16x128xf32, #tpu.memory_space<vmem>>, vector<16x128xf32>
    %c0_1 = arith.constant 0 : index
    %c0_2 = arith.constant 0 : index
    %1 = vector.load %arg2[%c0_1, %c0_2] : memref<16x128xf32, #tpu.memory_space<vmem>>, vector<16x128xf32>
    %c0_3 = arith.constant 0 : index
    %c0_4 = arith.constant 0 : index
    %2 = vector.load %arg3[%c0_3, %c0_4] : memref<16x128xf32, #tpu.memory_space<vmem>>, vector<16x128xf32>
    %cst = arith.constant 1.11111116 : f32
    %3 = vector.broadcast %cst : f32 to vector<16x128xf32>
    %4 = arith.mulf %2, %3 : vector<16x128xf32>
    %5 = arith.mulf %1, %4 : vector<16x128xf32>
    %6 = arith.addf %0, %5 : vector<16x128xf32>
    %cst_5 = arith.constant dense<0.000000e+00> : vector<16xf32>
    %7 = vector.multi_reduction <add>, %6, %cst_5 [1] : vector<16x128xf32> to vector<16xf32>
    %8 = vector.shape_cast %7 : vector<16xf32> to vector<16x1xf32>
    %cst_6 = arith.constant 7.812500e-03 : f32
    %9 = vector.broadcast %cst_6 : f32 to vector<16x1xf32>
    %10 = arith.mulf %8, %9 : vector<16x1xf32>
    %11 = arith.mulf %6, %6 : vector<16x128xf32>
    %cst_7 = arith.constant dense<0.000000e+00> : vector<16xf32>
    %12 = vector.multi_reduction <add>, %11, %cst_7 [1] : vector<16x128xf32> to vector<16xf32>
    %13 = vector.shape_cast %12 : vector<16xf32> to vector<16x1xf32>
    %cst_8 = arith.constant 7.812500e-03 : f32
    %14 = vector.broadcast %cst_8 : f32 to vector<16x1xf32>
    %15 = arith.mulf %13, %14 : vector<16x1xf32>
    %16 = arith.mulf %10, %10 : vector<16x1xf32>
    %17 = arith.subf %15, %16 : vector<16x1xf32>
    %cst_9 = arith.constant 0.000000e+00 : f32
    %18 = vector.broadcast %cst_9 : f32 to vector<16x1xf32>
    %19 = arith.maximumf %17, %18 : vector<16x1xf32>
    %cst_10 = arith.constant 9.99999974E-6 : f32
    %20 = vector.broadcast %cst_10 : f32 to vector<16x1xf32>
    %21 = arith.addf %19, %20 : vector<16x1xf32>
    %22 = math.rsqrt %21 : vector<16x1xf32>
    %c0_11 = arith.constant 0 : index
    %c0_12 = arith.constant 0 : index
    %23 = vector.load %arg4[%c0_11, %c0_12] : memref<1x128xf32, #tpu.memory_space<vmem>>, vector<1x128xf32>
    %c0_13 = arith.constant 0 : index
    %c0_14 = arith.constant 0 : index
    %24 = vector.load %arg5[%c0_13, %c0_14] : memref<1x128xf32, #tpu.memory_space<vmem>>, vector<1x128xf32>
    %25 = vector.broadcast %10 : vector<16x1xf32> to vector<16x128xf32>
    %26 = arith.subf %6, %25 : vector<16x128xf32>
    %27 = vector.broadcast %22 : vector<16x1xf32> to vector<16x128xf32>
    %28 = arith.mulf %26, %27 : vector<16x128xf32>
    %29 = vector.broadcast %23 : vector<1x128xf32> to vector<16x128xf32>
    %30 = arith.mulf %28, %29 : vector<16x128xf32>
    %31 = vector.broadcast %24 : vector<1x128xf32> to vector<16x128xf32>
    %32 = arith.addf %30, %31 : vector<16x128xf32>
    %c0_15 = arith.constant 0 : index
    %c0_16 = arith.constant 0 : index
    %33 = vector.load %arg6[%c0_15, %c0_16] : memref<16x128xf32, #tpu.memory_space<vmem>>, vector<16x128xf32>
    tpu.vector_store %arg6[%c0_15, %c0_16], %32 {strides = array<i32>} : memref<16x128xf32, #tpu.memory_space<vmem>>, vector<16x128xf32>,
    return
  }
  func.func @transform_0(%arg0: i32) -> (i32, i32) {
    %c0_i32 = arith.constant 0 : i32
    %c0_i32_0 = arith.constant 0 : i32
    return %arg0, %c0_i32 : i32, i32
  }
  func.func @transform_1(%arg0: i32) -> (i32, i32) {
    %c0_i32 = arith.constant 0 : i32
    %c0_i32_0 = arith.constant 0 : i32
    return %arg0, %c0_i32 : i32, i32
  }
  func.func @transform_2(%arg0: i32) -> (i32, i32) {
    %c0_i32 = arith.constant 0 : i32
    %c0_i32_0 = arith.constant 0 : i32
    return %arg0, %c0_i32 : i32, i32
  }
  func.func @transform_3(%arg0: i32) -> (i32, i32) {
    %c0_i32 = arith.constant 0 : i32
    %c0_i32_0 = arith.constant 0 : i32
    %c0_i32_1 = arith.constant 0 : i32
    return %c0_i32, %c0_i32_0 : i32, i32
  }
  func.func @transform_4(%arg0: i32) -> (i32, i32) {
    %c0_i32 = arith.constant 0 : i32
    %c0_i32_0 = arith.constant 0 : i32
    %c0_i32_1 = arith.constant 0 : i32
    return %c0_i32, %c0_i32_0 : i32, i32
  }
  func.func @transform_5(%arg0: i32) -> (i32, i32) {
    %c0_i32 = arith.constant 0 : i32
    %c0_i32_0 = arith.constant 0 : i32
    return %arg0, %c0_i32 : i32, i32
  }
}

</mosaic_0001>

<bundles_post_ra>
// kernel: tpu_custom_call.1
= control target key start
LH: loop header
LB: loop body
LE: loop exit
PB: predicated region body
PF: predicated region fallthrough
CT: control target
= control target key end

     0   :  { %10 = vsyncpa [#allocation3], 0  ;;  %s455_s0 = inlined_call_operand.hbm [shape: f32[16,128], index: 0, kind: input, shape index: {}]   ;;  %s456_s1 = inlined_call_operand.hbm [shape: f32[16,128], index: 1, kind: input, shape index: {}]   ;;  %s457_s2 = inlined_call_operand.hbm [shape: f32[16,128], index: 2, kind: input, shape index: {}]   ;;  %s458_s3 = inlined_call_operand.hbm [shape: f32[1,128], index: 3, kind: input, shape index: {}]   ;;  %s459_s4 = inlined_call_operand.hbm [shape: f32[1,128], index: 4, kind: input, shape index: {}]   ;;  %s460_s5 = inlined_call_operand.hbm [shape: f32[16,128], index: 5, kind: output, shape index: {}]  }
   0x1   :  { %11 = vsyncpa [#allocation6], 0 }
   0x2   :  { %12 = vsyncpa [#allocation9], 0 }
   0x3   :  { %13 = vsyncpa [#allocation4], 0  ;;  %s318_s18 = smov [#allocation5]   ;;  %s319_s20 = smov [#allocation8]  }
   0x4   :  { %s31_s19 = sshll.u32 %s318_s18, 4  ;;  %s56_s21 = sshll.u32 %s319_s20, 4  ;;  %s32_s19 = int_to_ptr.vmem [resolvable:$true] %s31_s19  ;;  %s356_s21 = int_to_ptr.vmem [resolvable:$true] %s56_s21 }
   0x5   :  { %s178_s24 = scalar_lea.hbm %s456_s1, 256 }
   0x6   :  { %p179_p0 = scmp.ne.s32.totalorder %s456_s1, %s178_s24  ;;  %p182_p1 = scmp.lt.u32.totalorder %s178_s24, %s456_s1 }
   0x8   :  { %p184_p2 = pnand %p182_p1, %p179_p0 }
   0xa   :  { %187 = shalt.err (!%p184_p2)
}
   0xb   :  { %s188_s29 = scalar_lea.vmem %s32_s19, 256  ;;  %p193_p4 = scmp.lt.s32.totalorder %s32_s19, %s32_s19 }
   0xc   :  { %p189_p3 = scmp.ne.s32.totalorder %s32_s19, %s188_s29  ;;  %p194_p5 = scmp.lt.s32.totalorder %s188_s29, %s188_s29 }
   0xe   :  { %p195_p6 = por %p194_p5, %p193_p4 }
  0x10   :  { %p196_p7 = pnand %p195_p6, %p189_p3 }
  0x12   :  { %199 = shalt.err (!%p196_p7)
}
  0x13   :  { %s320_s30 = smov 128   ;;  %s321_s6 = smov 8  }
  0x14   :  { %37 = dma.hbm_to_vmem [thread:$0]  %s456_s1, 256, %s32_s19, [#allocation6], %s320_s30, %s320_s30, %s321_s6  }
  0x15   :  { %s200_s11 = scalar_lea.hbm %s458_s3, 16 }
  0x16   :  { %p201_p8 = scmp.ne.s32.totalorder %s458_s3, %s200_s11  ;;  %p204_p9 = scmp.lt.u32.totalorder %s200_s11, %s458_s3 }
  0x18   :  { %p206_p10 = pnand %p204_p9, %p201_p8 }
  0x1a   :  { %209 = shalt.err (!%p206_p10)
}
  0x1b   :  { %s210_s16 = scalar_lea.vmem %s356_s21, 16  ;;  %s214_s1 = scalar_lea.vmem %s356_s21, 32 }
  0x1c   :  { %p211_p11 = scmp.ne.s32.totalorder %s356_s21, %s210_s16  ;;  %p215_p12 = scmp.lt.s32.totalorder %s356_s21, %s356_s21 }
  0x1d   :  { %p216_p13 = scmp.lt.s32.totalorder %s214_s1, %s210_s16 }
  0x1f   :  { %p217_p0 = por %p216_p13, %p215_p12 }
  0x21   :  { %p218_p1 = pnand %p217_p0, %p211_p11 }
  0x23   :  { %221 = shalt.err (!%p218_p1)
}
  0x24   :  { %59 = dma.hbm_to_vmem [thread:$0]  %s458_s3, 16, %s356_s21, [#allocation9]  }
  0x25   :  { %s322_s19 = smov [#allocation2]   ;;  %s323_s22 = smov [#allocation7]  }
  0x26   :  { %s19_s20 = sshll.u32 %s322_s19, 4  ;;  %s43_s23 = sshll.u32 %s323_s22, 4  ;;  %s20_s20 = int_to_ptr.vmem [resolvable:$true] %s19_s20  ;;  %s391_s23 = int_to_ptr.vmem [resolvable:$true] %s43_s23 }
  0x27   :  { %s222_s26 = scalar_lea.hbm %s455_s0, 256 }
  0x28   :  { %p223_p2 = scmp.ne.s32.totalorder %s455_s0, %s222_s26  ;;  %p226_p3 = scmp.lt.u32.totalorder %s222_s26, %s455_s0 }
  0x2a   :  { %p228_p4 = pnand %p226_p3, %p223_p2 }
  0x2c   :  { %231 = shalt.err (!%p228_p4)
}
  0x2d   :  { %s232_s3 = scalar_lea.vmem %s20_s20, 256  ;;  %p237_p6 = scmp.lt.s32.totalorder %s20_s20, %s20_s20 }
  0x2e   :  { %p233_p5 = scmp.ne.s32.totalorder %s20_s20, %s232_s3  ;;  %p238_p7 = scmp.lt.s32.totalorder %s232_s3, %s232_s3 }
  0x30   :  { %p239_p8 = por %p238_p7, %p237_p6 }
  0x32   :  { %p240_p9 = pnand %p239_p8, %p233_p5 }
  0x34   :  { %243 = shalt.err (!%p240_p9)
}
  0x35   :  { %25 = dma.hbm_to_vmem [thread:$0]  %s455_s0, 256, %s20_s20, [#allocation3], %s320_s30, %s320_s30, %s321_s6  }
  0x36   :  { %s244_s11 = scalar_lea.hbm %s457_s2, 256 }
  0x37   :  { %p245_p10 = scmp.ne.s32.totalorder %s457_s2, %s244_s11  ;;  %p248_p11 = scmp.lt.u32.totalorder %s244_s11, %s457_s2 }
  0x39   :  { %p250_p12 = pnand %p248_p11, %p245_p10 }
  0x3b   :  { %253 = shalt.err (!%p250_p12)
}
  0x3c   :  { %s254_s16 = scalar_lea.vmem %s391_s23, 256  ;;  %p259_p0 = scmp.lt.s32.totalorder %s391_s23, %s391_s23 }
  0x3d   :  { %p255_p13 = scmp.ne.s32.totalorder %s391_s23, %s254_s16  ;;  %p260_p1 = scmp.lt.s32.totalorder %s254_s16, %s254_s16 }
  0x3f   :  { %p261_p2 = por %p260_p1, %p259_p0 }
  0x41   :  { %p262_p3 = pnand %p261_p2, %p255_p13 }
  0x43   :  { %265 = shalt.err (!%p262_p3)
}
  0x44   :  { %49 = dma.hbm_to_vmem [thread:$0]  %s457_s2, 256, %s391_s23, [#allocation6], %s320_s30, %s320_s30, %s321_s6  }
  0x45   :  { %s324_s17 = smov [#allocation10]   ;;  %s266_s22 = scalar_lea.hbm %s459_s4, 16 }
  0x46   :  { %s66_s18 = sshll.u32 %s324_s17, 4  ;;  %p267_p4 = scmp.ne.s32.totalorder %s459_s4, %s266_s22  ;;  %s67_s18 = int_to_ptr.vmem [resolvable:$true] %s66_s18 }
  0x47   :  { %p270_p5 = scmp.lt.u32.totalorder %s266_s22, %s459_s4 }
  0x49   :  { %p272_p6 = pnand %p270_p5, %p267_p4 }
  0x4b   :  { %275 = shalt.err (!%p272_p6)
}
  0x4c   :  { %s276_s28 = scalar_lea.vmem %s67_s18, 16  ;;  %s280_s2 = scalar_lea.vmem %s67_s18, 32 }
  0x4d   :  { %p277_p7 = scmp.ne.s32.totalorder %s67_s18, %s276_s28  ;;  %p281_p8 = scmp.lt.s32.totalorder %s67_s18, %s67_s18 }
  0x4e   :  { %p282_p9 = scmp.lt.s32.totalorder %s280_s2, %s276_s28 }
  0x50   :  { %p283_p10 = por %p282_p9, %p281_p8 }
  0x52   :  { %p284_p11 = pnand %p283_p10, %p277_p7 }
  0x54   :  { %287 = shalt.err (!%p284_p11)
}
  0x55   :  { %69 = dma.hbm_to_vmem [thread:$0]  %s459_s4, 16, %s67_s18, [#allocation9]  }
  0x56   :  { %310 = dma.done.wait [#allocation3], 256  }
  0x57   :  { %311 = vsyncadd [#allocation3], 4294967040 }
  0x58   :  { %312 = dma.done.wait [#allocation6], 512  }
  0x59   :  { %313 = vsyncadd [#allocation6], 4294966784 }
  0x5a   :  { %314 = dma.done.wait [#allocation9], 32  }
  0x5b   :  { %315 = vsyncadd [#allocation9], 4294967264  ;;  %v87_v0 = vld [vmem:[#allocation5] sm:$0xff]  ;;  %v89_v1 = vld [vmem:[#allocation7] sm:$0xff]  ;;  %s325_s4 = smov [#allocation11]  }
  0x5c   :  { %v91_v2 = vmul.f32 1.1111112, %v89_v1  ;;  %v88_v3 = vld [vmem:[#allocation5 + $0x8] sm:$0xff]  ;;  %v90_v4 = vld [vmem:[#allocation7 + $0x8] sm:$0xff]  ;;  %v85_v5 = vld [vmem:[#allocation2] sm:$0xff]  ;;  %s150_s7 = sshll.u32 %s325_s4, 4  ;;  %s151_s7 = int_to_ptr.vmem [resolvable:$true] %s150_s7 }
  0x5d   :  { %v92_v6 = vmul.f32 1.1111112, %v90_v4  ;;  %v86_v8 = vld [vmem:[#allocation2 + $0x8] sm:$0xff]  ;;  %v164_v32 = vld [vmem:[#allocation8] ss:$0 sm:$0xff]  ;;  %s288_s3 = scalar_lea.vmem %s151_s7, 256  ;;  %p293_p13 = scmp.lt.s32.totalorder %s151_s7, %s151_s7 }
  0x5e   :  { %v93_v7 = vmul.f32 %v91_v2, %v87_v0  ;;  %v165_v34 = vld [vmem:[#allocation10] ss:$0 sm:$0xff]  ;;  %p289_p12 = scmp.ne.s32.totalorder %s151_s7, %s288_s3  ;;  %p294_p0 = scmp.lt.s32.totalorder %s288_s3, %s288_s3 }
  0x5f   :  { %v94_v9 = vmul.f32 %v92_v6, %v88_v3 }
  0x60   :  { %v95_v10 = vadd.f32 %v93_v7, %v85_v5  ;;  %p295_p1 = por %p294_p0, %p293_p13 }
  0x61   :  { %v96_v11 = vadd.f32 %v94_v9, %v86_v8 }
  0x62   :  { %97 = vadd.xlane.f32.xlu0 %v95_v10  ;;  %v103_v12 = vmul.f32 %v95_v10, %v95_v10  ;;  %p296_p2 = pnand %p295_p1, %p289_p12 }
  0x63   :  { %v104_v13 = vmul.f32 %v96_v11, %v96_v11 }
  0x64   :  { %105 = vadd.xlane.f32.xlu1 %v103_v12 }
  0x66   :  { %99 = vadd.xlane.f32.xlu0 %v96_v11 }
  0x68   :  { %107 = vadd.xlane.f32.xlu1 %v104_v13 }
  0xef   :  { %v98_v14 = vpop.xlane.xlu0 %97 }
  0xf0   :  { %v101_v15 = vmul.f32 0.0078125, %v98_v14 }
  0xf1   :  { %v106_v16 = vpop.xlane.xlu1 %105 }
  0xf2   :  { %v111_v17 = vmul.f32 %v101_v15, %v101_v15  ;;  %v109_v18 = vmul.f32 0.0078125, %v106_v16  ;;  %v123_v30 = vsub.f32 %v95_v10, %v101_v15 }
  0xf3   :  { %v100_v19 = vpop.xlane.xlu0 %99 }
  0xf4   :  { %v113_v20 = vsub.f32 %v109_v18, %v111_v17  ;;  %v102_v21 = vmul.f32 0.0078125, %v100_v19 }
  0xf5   :  { %v108_v22 = vpop.xlane.xlu1 %107 }
  0xf6   :  { %v115_v23 = vmax.f32 %v113_v20, 0.0  ;;  %v112_v24 = vmul.f32 %v102_v21, %v102_v21  ;;  %v110_v25 = vmul.f32 0.0078125, %v108_v22  ;;  %v124_v35 = vsub.f32 %v96_v11, %v102_v21 }
  0xf8   :  { %v117_v26 = vadd.f32 1e-05, %v115_v23  ;;  %v114_v27 = vsub.f32 %v110_v25, %v112_v24 }
  0xfa   :  { %174 = vrsqrt.f32 %v117_v26  ;;  %v116_v28 = vmax.f32 %v114_v27, 0.0 }
  0xfc   :  { %v118_v29 = vadd.f32 1e-05, %v116_v28 }
  0xfe   :  { %176 = vrsqrt.f32 %v118_v29 }
 0x104   :  { %v175_v31 = vpop.eup %174 }
 0x105   :  { %v125_v33 = vmul.f32 %v175_v31, %v123_v30 }
 0x107   :  { %v133_v36 = vmul.f32 %v164_v32, %v125_v33 }
 0x108   :  { %v177_v37 = vpop.eup %176 }
 0x109   :  { %v126_v38 = vmul.f32 %v177_v37, %v124_v35  ;;  %v141_v39 = vadd.f32 %v165_v34, %v133_v36 }
 0x10b   :  { %v134_v40 = vmul.f32 %v164_v32, %v126_v38  ;;  %143 = vst [vmem:[#allocation11] sm:$0xff] %v141_v39 }
 0x10d   :  { %v142_v41 = vadd.f32 %v165_v34, %v134_v40 }
 0x10f   :  { %144 = vst [vmem:[#allocation11 + $0x8] sm:$0xff] %v142_v41 }
 0x110   :  { %299 = shalt.err (!%p296_p2)
}
 0x111   :  { %s300_s9 = scalar_lea.hbm %s460_s5, 256 }
 0x112   :  { %p301_p3 = scmp.ne.s32.totalorder %s460_s5, %s300_s9  ;;  %p304_p4 = scmp.lt.u32.totalorder %s300_s9, %s460_s5 }
 0x114   :  { %p306_p5 = pnand %p304_p4, %p301_p3 }
 0x116   :  { %309 = shalt.err (!%p306_p5)
}
 0x117   :  { %156 = dma.vmem_to_hbm [thread:$0]  %s151_s7, 256, %s460_s5, [#allocation4], %s320_s30, %s320_s30, %s321_s6  }
 0x118   :  { %316 = dma.done.wait [#allocation4], 256  }
 0x119   :  { %317 = vsyncadd [#allocation4], 4294967040 }
 0x11a   :  { %160 = vsyncpa [#allocation3], 1 }
 0x11b   :  { %161 = vsyncpa [#allocation6], 1 }
 0x11c   :  { %162 = vsyncpa [#allocation9], 1 }
 0x11d   :  { %163 = vsyncpa [#allocation4], 1 }

</bundles_post_ra>
